<compile_context>
chip_gen: v7x
topology: tpu7x:2x2x1
jax: 0.10.0
libtpu: 0.0.40
codegen_flags: <defaults>
</compile_context>

<pallas_src>
import functools

import jax
import jax.numpy as jnp
from jax import lax
from jax.experimental import pallas as pl
from jax.experimental.pallas import tpu as pltpu

KSIZE = 7
PAD = 3


def _spatial_attention_kernel(w_ref, x_ref, o_ref, s_ref, m_ref, *,
                              total_c, c_chunk, needs_mask):
    # w_ref: SMEM (2, 7); row 0 = avg branch (1/C folded in), row 1 = max branch.
    # x_ref: VMEM (B_blk, C_blk, L) input tile.
    # o_ref: VMEM (B_blk, L) output slab (lane/sublane dense), written at last channel block.
    # s_ref/m_ref: VMEM (B_blk, L) f32 running sum / running max accumulators.
    B, CB, L = x_ref.shape
    k = pl.program_id(1)

    @pl.when(k == 0)
    def _init():
        s_ref[...] = jnp.zeros_like(s_ref)
        m_ref[...] = jnp.full_like(m_ref, -jnp.inf)

    c_base = k * CB  # global channel offset of this block (only used when masking)

    def reduce_chunk(c0, cs):
        chunk = x_ref[:, pl.ds(c0, cs), :].astype(jnp.float32)          # (B, cs, L)
        if needs_mask:
            # Last channel grid block may read past C; mask invalid channels.
            ch = c_base + c0 + lax.broadcasted_iota(jnp.int32, (B, cs, L), 1)
            ok = ch < total_c
            csum = jnp.sum(jnp.where(ok, chunk, 0.0), axis=1)           # (B, L)
            cmax = jnp.max(jnp.where(ok, chunk, -jnp.inf), axis=1)      # (B, L)
        else:
            csum = jnp.sum(chunk, axis=1)
            cmax = jnp.max(chunk, axis=1)
        s_ref[...] = s_ref[...] + csum
        m_ref[...] = jnp.maximum(m_ref[...], cmax)

    # ---- streamed channel reduction over sublane-sized chunks ----
    n_full = CB // c_chunk
    rem = CB % c_chunk
    if 0 < n_full <= 4:
        for j in range(n_full):                     # short: static unroll
            reduce_chunk(j * c_chunk, c_chunk)
    elif n_full > 4:
        def body(j, carry):                         # long: bounded liveness
            c0 = pl.multiple_of(j * c_chunk, c_chunk)
            reduce_chunk(c0, c_chunk)
            return carry
        lax.fori_loop(0, n_full, body, 0, unroll=2)
    if rem:
        reduce_chunk(n_full * c_chunk, rem)

    # ---- conv1d(kernel=7, pad=3, no bias) over [avg; max] via lane rolls ----
    @pl.when(k == pl.num_programs(1) - 1)
    def _finalize():
        s_acc = s_ref[...]
        m_acc = m_ref[...]
        # Hoist the 14 SMEM weight scalar reads out of the tap loop.
        w_avg = [w_ref[0, t] for t in range(KSIZE)]
        w_max = [w_ref[1, t] for t in range(KSIZE)]
        lane = lax.broadcasted_iota(jnp.int32, (1, L), 1)

        acc = w_avg[PAD] * s_acc + w_max[PAD] * m_acc        # center tap
        for t in range(KSIZE):
            s = t - PAD                   # tap offset: out[l] += w[t] * in[l + s]
            if s == 0:
                continue
            tap = w_avg[t] * s_acc + w_max[t] * m_acc        # (B, L)
            rolled = pltpu.roll(tap, shift=(-s) % L, axis=1)  # rolled[l] = tap[(l+s) mod L]
            # Zero the wrapped boundary lanes: single compare on a (1, L) iota.
            if s > 0:
                keep = jnp.where(lane < (L - s), 1.0, 0.0)    # (1, L) f32
            else:
                keep = jnp.where(lane >= (-s), 1.0, 0.0)
            acc = acc + rolled * keep
        o_ref[...] = jax.nn.sigmoid(acc).astype(o_ref.dtype)


def _pick_blocks(N, C, L, in_itemsize, out_itemsize, plan_bytes):
    """Choose (b_blk, c_blk) so the per-step live VMEM (double-buffered input +
    output + f32 accumulators + conv temporaries) stays around `plan_bytes`,
    while keeping blocks (8,128)-legal and >=2 batch blocks for megacore."""
    # bytes per batch-block row beyond the input tile itself:
    #   2x output buffers + 2x f32 accumulators + ~4 f32 conv temporaries
    extra_row = L * (2 * out_itemsize + 2 * 4 + 4 * 4)

    def per_row(c_blk):
        return 2 * c_blk * L * in_itemsize + extra_row

    min_rows = N if N < 8 else 8

    # Preferred: keep the full channel extent in one block (single-pass reduce).
    if min_rows * per_row(C) <= plan_bytes:
        rows = plan_bytes // per_row(C)
        if rows >= N:
            b_blk = N
        else:
            b_blk = max(8, (rows // 8) * 8)
        # Megacore: keep >= 2 batch blocks when the batch is big enough to split,
        # so the "parallel" axis can shard across v7x's two TensorCores.
        if N >= 16:
            cap = max(8, (pl.cdiv(N, 2) // 8) * 8)
            b_blk = min(b_blk, cap)
        return min(b_blk, N), C

    # Full C does not fit the budget even at the minimum batch block: tile channels.
    b_blk = min_rows
    if C <= 8:
        # Cannot tile channels below a sublane group.
        # TODO(synk): L-tiled variant with a 3-lane halo for huge single-row C*L.
        return b_blk, C
    c_budget = (plan_bytes // b_blk - extra_row) // (2 * L * in_itemsize)
    c_blk = max(8, (c_budget // 8) * 8)
    if c_blk >= C:
        return b_blk, C
    return b_blk, int(c_blk)


def spatial_attention(x, weight, *, plan_bytes=40 << 20, vmem_limit_bytes=56 << 20):
    """x: (N, C, L) float32/bfloat16, weight: (1, 2, 7) -> (N, 1, L) in x.dtype."""
    N, C, L = x.shape
    assert weight.shape == (1, 2, KSIZE)

    # Fold the 1/C of the channel-mean into the avg-branch weights;
    # the kernel then only needs a running sum.
    w2d = weight.reshape(2, KSIZE).astype(jnp.float32)
    w2d = w2d * jnp.array([[1.0 / C], [1.0]], dtype=jnp.float32)

    out_dtype = x.dtype
    b_blk, c_blk = _pick_blocks(N, C, L, x.dtype.itemsize,
                                jnp.dtype(out_dtype).itemsize, plan_bytes)
    needs_mask = (c_blk < C) and (C % c_blk != 0)
    c_chunk = 16 if x.dtype.itemsize == 2 else 8   # bf16 packs 16 sublanes/vreg

    grid = (pl.cdiv(N, b_blk), pl.cdiv(C, c_blk))

    kernel = functools.partial(_spatial_attention_kernel,
                               total_c=C, c_chunk=c_chunk, needs_mask=needs_mask)

    out2d = pl.pallas_call(
        kernel,
        out_shape=jax.ShapeDtypeStruct((N, L), out_dtype),
        grid=grid,
        in_specs=[
            pl.BlockSpec(memory_space=pltpu.SMEM),                    # weights (2, 7)
            pl.BlockSpec((b_blk, c_blk, L), lambda i, k: (i, k, 0)),  # x tile
        ],
        out_specs=pl.BlockSpec((b_blk, L), lambda i, k: (i, 0)),      # dense output slab
        scratch_shapes=[
            pltpu.VMEM((b_blk, L), jnp.float32),   # running sum
            pltpu.VMEM((b_blk, L), jnp.float32),   # running max
        ],
        compiler_params=pltpu.CompilerParams(
            dimension_semantics=("parallel", "arbitrary"),
            # 56 MiB: > v5e's 16 MiB scoped default, < v7x's 64 MiB physical.
            vmem_limit_bytes=vmem_limit_bytes,
        ),
    )(w2d, x)

    return out2d[:, None, :]  # (N, 1, L)


def spatial_attention_ref(x, weight):
    """Pure-JAX reference matching the PyTorch forward."""
    xf = x.astype(jnp.float32)
    avg = jnp.mean(xf, axis=1, keepdims=True)
    mx = jnp.max(xf, axis=1, keepdims=True)
    cat = jnp.concatenate([avg, mx], axis=1)                     # (N, 2, L)
    y = lax.conv_general_dilated(
        cat, weight.astype(jnp.float32), window_strides=(1,),
        padding=[(PAD, PAD)], dimension_numbers=("NCH", "OIH", "NCH"))
    return jax.nn.sigmoid(y)


if __name__ == "__main__":
    key = jax.random.PRNGKey(0)

    # Deterministic Conv1d weight init (PyTorch default: U(-b, b), b = 1/sqrt(fan_in)).
    fan_in = 2 * KSIZE
    bound = 1.0 / (fan_in ** 0.5)

    cases = [
        ((2, 4, 128), {}),                                   # tiny, full batch in one block
        ((3, 9, 256), {}),                                   # odd C, single block
        ((16, 64, 256), {}),                                 # 2 batch blocks (megacore) + fori_loop chunks
        ((16, 24, 256), dict(plan_bytes=256 << 10)),         # forced channel-tiled grid (C % c_blk == 0)
        ((8, 20, 256), dict(plan_bytes=256 << 10)),          # channel-tiled + masked partial channel block
    ]

    for (N, C, L), kwargs in cases:
        kx, kw, key = jax.random.split(key, 3)
        x = jax.random.normal(kx, (N, C, L), dtype=jnp.float32)
        weight = jax.random.uniform(kw, (1, 2, KSIZE), jnp.float32, -bound, bound)

        out = jax.block_until_ready(spatial_attention(x, weight, **kwargs))
        ref = spatial_attention_ref(x, weight)
        assert out.shape == (N, 1, L)
        assert jnp.allclose(out, ref, atol=1e-5, rtol=1e-5), f"mismatch at {(N, C, L)}"

    print("KERNEL_OK")
</pallas_src>

<mosaic_0001>
module attributes {stable_mosaic.version = 11 : i64} {
  func.func @_spatial_attention_kernel(%arg0: i32, %arg1: i32, %arg2: memref<2x7xf32, #tpu.memory_space<smem>>, %arg3: memref<2x4x128xf32, #tpu.memory_space<vmem>>, %arg4: memref<2x128xf32, #tpu.memory_space<vmem>>, %arg5: memref<2x128xf32, #tpu.memory_space<vmem>>, %arg6: memref<2x128xf32, #tpu.memory_space<vmem>>) attributes {dimension_semantics = [#tpu.dimension_semantics<parallel>, #tpu.dimension_semantics<arbitrary>], iteration_bounds = array<i64: 1, 1>, scalar_prefetch = 0 : i64, scratch_operands = 2 : i64, tpu.core_type = #tpu.core_type<tc>, window_params = [{transform_indices = @transform_0, window_bounds = array<i64: 2, 7>}, {transform_indices = @transform_1, window_bounds = array<i64: 2, 4, 128>}, {transform_indices = @transform_2, window_bounds = array<i64: 2, 128>}]} {
    %c0_i32 = arith.constant 0 : i32
    %0 = arith.cmpi eq, %arg1, %c0_i32 : i32
    %1 = arith.extui %0 : i1 to i32
    %c0_i32_0 = arith.constant 0 : i32
    %2 = arith.cmpi ne, %1, %c0_i32_0 : i32
    scf.if %2 {
      %cst_14 = arith.constant 0.000000e+00 : f32
      %15 = vector.broadcast %cst_14 : f32 to vector<2x128xf32>
      %c0_15 = arith.constant 0 : index
      %c0_16 = arith.constant 0 : index
      %16 = vector.load %arg5[%c0_15, %c0_16] : memref<2x128xf32, #tpu.memory_space<vmem>>, vector<2x128xf32>
      tpu.vector_store %arg5[%c0_15, %c0_16], %15 {strides = array<i32>} : memref<2x128xf32, #tpu.memory_space<vmem>>, vector<2x128xf32>,
      %cst_17 = arith.constant 0xFF800000 : f32
      %17 = vector.broadcast %cst_17 : f32 to vector<2x128xf32>
      %c0_18 = arith.constant 0 : index
      %c0_19 = arith.constant 0 : index
      %18 = vector.load %arg6[%c0_18, %c0_19] : memref<2x128xf32, #tpu.memory_space<vmem>>, vector<2x128xf32>
      tpu.vector_store %arg6[%c0_18, %c0_19], %17 {strides = array<i32>} : memref<2x128xf32, #tpu.memory_space<vmem>>, vector<2x128xf32>,
    } else {
    }
    %c0 = arith.constant 0 : index
    %c0_1 = arith.constant 0 : index
    %c0_2 = arith.constant 0 : index
    %3 = vector.load %arg3[%c0, %c0_1, %c0_2] : memref<2x4x128xf32, #tpu.memory_space<vmem>>, vector<2x4x128xf32>
    %cst = arith.constant dense<0.000000e+00> : vector<2x128xf32>
    %4 = vector.multi_reduction <add>, %3, %cst [1] : vector<2x4x128xf32> to vector<2x128xf32>
    %cst_3 = arith.constant dense<0xFF800000> : vector<2x128xf32>
    %5 = vector.multi_reduction <maximumf>, %3, %cst_3 [1] : vector<2x4x128xf32> to vector<2x128xf32>
    %c0_4 = arith.constant 0 : index
    %c0_5 = arith.constant 0 : index
    %6 = vector.load %arg5[%c0_4, %c0_5] : memref<2x128xf32, #tpu.memory_space<vmem>>, vector<2x128xf32>
    %7 = arith.addf %6, %4 : vector<2x128xf32>
    %c0_6 = arith.constant 0 : index
    %c0_7 = arith.constant 0 : index
    %8 = vector.load %arg5[%c0_6, %c0_7] : memref<2x128xf32, #tpu.memory_space<vmem>>, vector<2x128xf32>
    tpu.vector_store %arg5[%c0_6, %c0_7], %7 {strides = array<i32>} : memref<2x128xf32, #tpu.memory_space<vmem>>, vector<2x128xf32>,
    %c0_8 = arith.constant 0 : index
    %c0_9 = arith.constant 0 : index
    %9 = vector.load %arg6[%c0_8, %c0_9] : memref<2x128xf32, #tpu.memory_space<vmem>>, vector<2x128xf32>
    %10 = arith.maximumf %9, %5 : vector<2x128xf32>
    %c0_10 = arith.constant 0 : index
    %c0_11 = arith.constant 0 : index
    %11 = vector.load %arg6[%c0_10, %c0_11] : memref<2x128xf32, #tpu.memory_space<vmem>>, vector<2x128xf32>
    tpu.vector_store %arg6[%c0_10, %c0_11], %10 {strides = array<i32>} : memref<2x128xf32, #tpu.memory_space<vmem>>, vector<2x128xf32>,
    %c0_i32_12 = arith.constant 0 : i32
    %12 = arith.cmpi eq, %arg1, %c0_i32_12 : i32
    %13 = arith.extui %12 : i1 to i32
    %c0_i32_13 = arith.constant 0 : i32
    %14 = arith.cmpi ne, %13, %c0_i32_13 : i32
    scf.if %14 {
      %c0_14 = arith.constant 0 : index
      %c0_15 = arith.constant 0 : index
      %15 = vector.load %arg5[%c0_14, %c0_15] : memref<2x128xf32, #tpu.memory_space<vmem>>, vector<2x128xf32>
      %c0_16 = arith.constant 0 : index
      %c0_17 = arith.constant 0 : index
      %16 = vector.load %arg6[%c0_16, %c0_17] : memref<2x128xf32, #tpu.memory_space<vmem>>, vector<2x128xf32>
      %c0_18 = arith.constant 0 : index
      %c0_19 = arith.constant 0 : index
      %17 = memref.load %arg2[%c0_18, %c0_19] : memref<2x7xf32, #tpu.memory_space<smem>>
      %c0_20 = arith.constant 0 : index
      %c1 = arith.constant 1 : index
      %18 = memref.load %arg2[%c0_20, %c1] : memref<2x7xf32, #tpu.memory_space<smem>>
      %c0_21 = arith.constant 0 : index
      %c2 = arith.constant 2 : index
      %19 = memref.load %arg2[%c0_21, %c2] : memref<2x7xf32, #tpu.memory_space<smem>>
      %c0_22 = arith.constant 0 : index
      %c3 = arith.constant 3 : index
      %20 = memref.load %arg2[%c0_22, %c3] : memref<2x7xf32, #tpu.memory_space<smem>>
      %c0_23 = arith.constant 0 : index
      %c4 = arith.constant 4 : index
      %21 = memref.load %arg2[%c0_23, %c4] : memref<2x7xf32, #tpu.memory_space<smem>>
      %c0_24 = arith.constant 0 : index
      %c5 = arith.constant 5 : index
      %22 = memref.load %arg2[%c0_24, %c5] : memref<2x7xf32, #tpu.memory_space<smem>>
      %c0_25 = arith.constant 0 : index
      %c6 = arith.constant 6 : index
      %23 = memref.load %arg2[%c0_25, %c6] : memref<2x7xf32, #tpu.memory_space<smem>>
      %c1_26 = arith.constant 1 : index
      %c0_27 = arith.constant 0 : index
      %24 = memref.load %arg2[%c1_26, %c0_27] : memref<2x7xf32, #tpu.memory_space<smem>>
      %c1_28 = arith.constant 1 : index
      %c1_29 = arith.constant 1 : index
      %25 = memref.load %arg2[%c1_28, %c1_29] : memref<2x7xf32, #tpu.memory_space<smem>>
      %c1_30 = arith.constant 1 : index
      %c2_31 = arith.constant 2 : index
      %26 = memref.load %arg2[%c1_30, %c2_31] : memref<2x7xf32, #tpu.memory_space<smem>>
      %c1_32 = arith.constant 1 : index
      %c3_33 = arith.constant 3 : index
      %27 = memref.load %arg2[%c1_32, %c3_33] : memref<2x7xf32, #tpu.memory_space<smem>>
      %c1_34 = arith.constant 1 : index
      %c4_35 = arith.constant 4 : index
      %28 = memref.load %arg2[%c1_34, %c4_35] : memref<2x7xf32, #tpu.memory_space<smem>>
      %c1_36 = arith.constant 1 : index
      %c5_37 = arith.constant 5 : index
      %29 = memref.load %arg2[%c1_36, %c5_37] : memref<2x7xf32, #tpu.memory_space<smem>>
      %c1_38 = arith.constant 1 : index
      %c6_39 = arith.constant 6 : index
      %30 = memref.load %arg2[%c1_38, %c6_39] : memref<2x7xf32, #tpu.memory_space<smem>>
      %31 = tpu.iota {dimensions = array<i32: 1>} : vector<1x128xi32>
      %32 = vector.broadcast %20 : f32 to vector<2x128xf32>
      %33 = arith.mulf %32, %15 : vector<2x128xf32>
      %34 = vector.broadcast %27 : f32 to vector<2x128xf32>
      %35 = arith.mulf %34, %16 : vector<2x128xf32>
      %36 = arith.addf %33, %35 : vector<2x128xf32>
      %37 = vector.broadcast %17 : f32 to vector<2x128xf32>
      %38 = arith.mulf %37, %15 : vector<2x128xf32>
      %39 = vector.broadcast %24 : f32 to vector<2x128xf32>
      %40 = arith.mulf %39, %16 : vector<2x128xf32>
      %41 = arith.addf %38, %40 : vector<2x128xf32>
      %c3_i32 = arith.constant 3 : i32
      %42 = tpu.dynamic_rotate %41 by %c3_i32 dim 1 : vector<2x128xf32>, i32 -> vector<2x128xf32>
      %c3_i32_40 = arith.constant 3 : i32
      %43 = vector.broadcast %c3_i32_40 : i32 to vector<1x128xi32>
      %44 = arith.cmpi sge, %31, %43 : vector<1x128xi32>
      %cst_41 = arith.constant 1.000000e+00 : f32
      %cst_42 = arith.constant 0.000000e+00 : f32
      %45 = vector.broadcast %cst_41 : f32 to vector<1x128xf32>
      %46 = vector.broadcast %cst_42 : f32 to vector<1x128xf32>
      %47 = arith.select %44, %45, %46 : vector<1x128xi1>, vector<1x128xf32>
      %48 = vector.broadcast %47 : vector<1x128xf32> to vector<2x128xf32>
      %49 = arith.mulf %42, %48 : vector<2x128xf32>
      %50 = arith.addf %36, %49 : vector<2x128xf32>
      %51 = vector.broadcast %18 : f32 to vector<2x128xf32>
      %52 = arith.mulf %51, %15 : vector<2x128xf32>
      %53 = vector.broadcast %25 : f32 to vector<2x128xf32>
      %54 = arith.mulf %53, %16 : vector<2x128xf32>
      %55 = arith.addf %52, %54 : vector<2x128xf32>
      %c2_i32 = arith.constant 2 : i32
      %56 = tpu.dynamic_rotate %55 by %c2_i32 dim 1 : vector<2x128xf32>, i32 -> vector<2x128xf32>
      %c2_i32_43 = arith.constant 2 : i32
      %57 = vector.broadcast %c2_i32_43 : i32 to vector<1x128xi32>
      %58 = arith.cmpi sge, %31, %57 : vector<1x128xi32>
      %cst_44 = arith.constant 1.000000e+00 : f32
      %cst_45 = arith.constant 0.000000e+00 : f32
      %59 = vector.broadcast %cst_44 : f32 to vector<1x128xf32>
      %60 = vector.broadcast %cst_45 : f32 to vector<1x128xf32>
      %61 = arith.select %58, %59, %60 : vector<1x128xi1>, vector<1x128xf32>
      %62 = vector.broadcast %61 : vector<1x128xf32> to vector<2x128xf32>
      %63 = arith.mulf %56, %62 : vector<2x128xf32>
      %64 = arith.addf %50, %63 : vector<2x128xf32>
      %65 = vector.broadcast %19 : f32 to vector<2x128xf32>
      %66 = arith.mulf %65, %15 : vector<2x128xf32>
      %67 = vector.broadcast %26 : f32 to vector<2x128xf32>
      %68 = arith.mulf %67, %16 : vector<2x128xf32>
      %69 = arith.addf %66, %68 : vector<2x128xf32>
      %c1_i32 = arith.constant 1 : i32
      %70 = tpu.dynamic_rotate %69 by %c1_i32 dim 1 : vector<2x128xf32>, i32 -> vector<2x128xf32>
      %c1_i32_46 = arith.constant 1 : i32
      %71 = vector.broadcast %c1_i32_46 : i32 to vector<1x128xi32>
      %72 = arith.cmpi sge, %31, %71 : vector<1x128xi32>
      %cst_47 = arith.constant 1.000000e+00 : f32
      %cst_48 = arith.constant 0.000000e+00 : f32
      %73 = vector.broadcast %cst_47 : f32 to vector<1x128xf32>
      %74 = vector.broadcast %cst_48 : f32 to vector<1x128xf32>
      %75 = arith.select %72, %73, %74 : vector<1x128xi1>, vector<1x128xf32>
      %76 = vector.broadcast %75 : vector<1x128xf32> to vector<2x128xf32>
      %77 = arith.mulf %70, %76 : vector<2x128xf32>
      %78 = arith.addf %64, %77 : vector<2x128xf32>
      %79 = vector.broadcast %21 : f32 to vector<2x128xf32>
      %80 = arith.mulf %79, %15 : vector<2x128xf32>
      %81 = vector.broadcast %28 : f32 to vector<2x128xf32>
      %82 = arith.mulf %81, %16 : vector<2x128xf32>
      %83 = arith.addf %80, %82 : vector<2x128xf32>
      %c127_i32 = arith.constant 127 : i32
      %84 = tpu.dynamic_rotate %83 by %c127_i32 dim 1 : vector<2x128xf32>, i32 -> vector<2x128xf32>
      %c127_i32_49 = arith.constant 127 : i32
      %85 = vector.broadcast %c127_i32_49 : i32 to vector<1x128xi32>
      %86 = arith.cmpi slt, %31, %85 : vector<1x128xi32>
      %cst_50 = arith.constant 1.000000e+00 : f32
      %cst_51 = arith.constant 0.000000e+00 : f32
      %87 = vector.broadcast %cst_50 : f32 to vector<1x128xf32>
      %88 = vector.broadcast %cst_51 : f32 to vector<1x128xf32>
      %89 = arith.select %86, %87, %88 : vector<1x128xi1>, vector<1x128xf32>
      %90 = vector.broadcast %89 : vector<1x128xf32> to vector<2x128xf32>
      %91 = arith.mulf %84, %90 : vector<2x128xf32>
      %92 = arith.addf %78, %91 : vector<2x128xf32>
      %93 = vector.broadcast %22 : f32 to vector<2x128xf32>
      %94 = arith.mulf %93, %15 : vector<2x128xf32>
      %95 = vector.broadcast %29 : f32 to vector<2x128xf32>
      %96 = arith.mulf %95, %16 : vector<2x128xf32>
      %97 = arith.addf %94, %96 : vector<2x128xf32>
      %c126_i32 = arith.constant 126 : i32
      %98 = tpu.dynamic_rotate %97 by %c126_i32 dim 1 : vector<2x128xf32>, i32 -> vector<2x128xf32>
      %c126_i32_52 = arith.constant 126 : i32
      %99 = vector.broadcast %c126_i32_52 : i32 to vector<1x128xi32>
      %100 = arith.cmpi slt, %31, %99 : vector<1x128xi32>
      %cst_53 = arith.constant 1.000000e+00 : f32
      %cst_54 = arith.constant 0.000000e+00 : f32
      %101 = vector.broadcast %cst_53 : f32 to vector<1x128xf32>
      %102 = vector.broadcast %cst_54 : f32 to vector<1x128xf32>
      %103 = arith.select %100, %101, %102 : vector<1x128xi1>, vector<1x128xf32>
      %104 = vector.broadcast %103 : vector<1x128xf32> to vector<2x128xf32>
      %105 = arith.mulf %98, %104 : vector<2x128xf32>
      %106 = arith.addf %92, %105 : vector<2x128xf32>
      %107 = vector.broadcast %23 : f32 to vector<2x128xf32>
      %108 = arith.mulf %107, %15 : vector<2x128xf32>
      %109 = vector.broadcast %30 : f32 to vector<2x128xf32>
      %110 = arith.mulf %109, %16 : vector<2x128xf32>
      %111 = arith.addf %108, %110 : vector<2x128xf32>
      %c125_i32 = arith.constant 125 : i32
      %112 = tpu.dynamic_rotate %111 by %c125_i32 dim 1 : vector<2x128xf32>, i32 -> vector<2x128xf32>
      %c125_i32_55 = arith.constant 125 : i32
      %113 = vector.broadcast %c125_i32_55 : i32 to vector<1x128xi32>
      %114 = arith.cmpi slt, %31, %113 : vector<1x128xi32>
      %cst_56 = arith.constant 1.000000e+00 : f32
      %cst_57 = arith.constant 0.000000e+00 : f32
      %115 = vector.broadcast %cst_56 : f32 to vector<1x128xf32>
      %116 = vector.broadcast %cst_57 : f32 to vector<1x128xf32>
      %117 = arith.select %114, %115, %116 : vector<1x128xi1>, vector<1x128xf32>
      %118 = vector.broadcast %117 : vector<1x128xf32> to vector<2x128xf32>
      %119 = arith.mulf %112, %118 : vector<2x128xf32>
      %120 = arith.addf %106, %119 : vector<2x128xf32>
      %121 = arith.negf %120 : vector<2x128xf32>
      %122 = math.exp %121 : vector<2x128xf32>
      %cst_58 = arith.constant 1.000000e+00 : f32
      %123 = vector.broadcast %cst_58 : f32 to vector<2x128xf32>
      %124 = arith.addf %123, %122 : vector<2x128xf32>
      %125 = arith.divf %123, %124 : vector<2x128xf32>
      %c0_59 = arith.constant 0 : index
      %c0_60 = arith.constant 0 : index
      %126 = vector.load %arg4[%c0_59, %c0_60] : memref<2x128xf32, #tpu.memory_space<vmem>>, vector<2x128xf32>
      tpu.vector_store %arg4[%c0_59, %c0_60], %125 {strides = array<i32>} : memref<2x128xf32, #tpu.memory_space<vmem>>, vector<2x128xf32>,
    } else {
    }
    return
  }
  func.func @transform_0(%arg0: i32, %arg1: i32) -> (i32, i32) {
    %c0_i32 = arith.constant 0 : i32
    %c0_i32_0 = arith.constant 0 : i32
    %c0_i32_1 = arith.constant 0 : i32
    return %c0_i32, %c0_i32_0 : i32, i32
  }
  func.func @transform_1(%arg0: i32, %arg1: i32) -> (i32, i32, i32) {
    %c0_i32 = arith.constant 0 : i32
    %c0_i32_0 = arith.constant 0 : i32
    return %arg0, %arg1, %c0_i32 : i32, i32, i32
  }
  func.func @transform_2(%arg0: i32, %arg1: i32) -> (i32, i32) {
    %c0_i32 = arith.constant 0 : i32
    %c0_i32_0 = arith.constant 0 : i32
    return %arg0, %c0_i32 : i32, i32
  }
}

</mosaic_0001>

<bundles_post_ra>
// kernel: tpu_custom_call.1
= control target key start
LH: loop header
LB: loop body
LE: loop exit
PB: predicated region body
PF: predicated region fallthrough
CT: control target
= control target key end

     0   :  { %7 = vsyncpa [#allocation7], 0  ;;  %s408_s0 = inlined_call_operand.hbm [shape: f32[2,7], index: 0, kind: input, shape index: {}]   ;;  %s409_s1 = inlined_call_operand.hbm [shape: f32[2,4,128], index: 1, kind: input, shape index: {}]   ;;  %s410_s2 = inlined_call_operand.hbm [shape: f32[2,128], index: 2, kind: output, shape index: {}]  }
   0x1   :  { %8 = vsyncpa [#allocation5], 0 }
   0x2   :  { %9 = vsyncpa [#allocation6], 0  ;;  %s235_s11 = scalar_lea.hbm %s408_s0, 32 }
   0x3   :  { %p236_p0 = scmp.ne.s32.totalorder %s408_s0, %s235_s11  ;;  %p239_p1 = scmp.lt.u32.totalorder %s235_s11, %s408_s0 }
   0x5   :  { %p241_p2 = pnand %p239_p1, %p236_p0 }
   0x7   :  { %244 = shalt.err (!%p241_p2)
}
   0x8   :  { %s295_s16 = smov [#allocation4]   ;;  %s296_s19 = smov [#allocation8]  }
   0x9   :  { %17 = dma.hbm_to_smem %s408_s0, 32, %s295_s16, [#allocation7]  }
   0xa   :  { %s23_s20 = sshll.u32 %s296_s19, 4  ;;  %s245_s23 = scalar_lea.hbm %s409_s1, 128  ;;  %s24_s20 = int_to_ptr.vmem [resolvable:$true] %s23_s20 }
   0xb   :  { %p246_p3 = scmp.ne.s32.totalorder %s409_s1, %s245_s23  ;;  %p249_p4 = scmp.lt.u32.totalorder %s245_s23, %s409_s1 }
   0xd   :  { %p251_p5 = pnand %p249_p4, %p246_p3 }
   0xf   :  { %254 = shalt.err (!%p251_p5)
}
  0x10   :  { %s255_s28 = scalar_lea.vmem %s24_s20, 128  ;;  %p260_p7 = scmp.lt.s32.totalorder %s24_s20, %s24_s20 }
  0x11   :  { %p256_p6 = scmp.ne.s32.totalorder %s24_s20, %s255_s28  ;;  %p261_p8 = scmp.lt.s32.totalorder %s255_s28, %s255_s28 }
  0x13   :  { %p262_p9 = por %p261_p8, %p260_p7 }
  0x15   :  { %p263_p10 = pnand %p262_p9, %p256_p6 }
  0x17   :  { %266 = shalt.err (!%p263_p10)
}
  0x18   :  { %s297_s0 = smov 64   ;;  %s298_s29 = smov 4  }
  0x19   :  { %29 = dma.hbm_to_vmem [thread:$0]  %s409_s1, 128, %s24_s20, [#allocation5], %s297_s0, %s297_s0, %s298_s29  }
  0x1a   :  { %289 = dma.done.wait [#allocation7], 32  }
  0x1b   :  { %290 = vsyncadd [#allocation7], 4294967264 }
  0x1c   :  { %291 = dma.done.wait [#allocation5], 128  }
  0x1d   :  { %292 = vsyncadd [#allocation5], 4294967168 }
  0x1e   :  { %36 = sfence }
  0x1f   :  { %v43_v0 = vld [vmem:[#allocation8] sm:$0xf]  ;;  %v44_v1 = vld [vmem:[#allocation8 + $0x4] sm:$0xf]  ;;  %v299_v2 = vmov 0.0   ;;  %v300_v3 = vmov -inf  }
  0x20   :  { %41 = vst [vmem:[#allocation2] sm:$0x3] %v299_v2  ;;  %42 = vst [vmem:[#allocation3] sm:$0x3] %v300_v3  ;;  %vm45_vm0 = vcmask 1043456   ;;  %s348_s1 = sld [smem:[#allocation4]] }
  0x21   :  { %v46_v4 = vsel %vm45_vm0, %v43_v0, 0.0  ;;  %v53_v5 = vsel %vm45_vm0, %v44_v1, 0.0  ;;  %v60_v6 = vsel %vm45_vm0, %v43_v0, -inf  ;;  %v67_v7 = vsel %vm45_vm0, %v44_v1, -inf  ;;  %s350_s4 = sld [smem:[#allocation4 + $0x80]]  ;;  %s352_s5 = sld [smem:[#allocation4 + $0x2]] }
  0x22   :  { %v47_v8 = vrot.slane %v46_v4, 4  ;;  %v54_v9 = vrot.slane %v53_v5, 4  ;;  %v61_v10 = vrot.slane %v60_v6, 4  ;;  %v68_v11 = vrot.slane %v67_v7, 4  ;;  %s354_s6 = sld [smem:[#allocation4 + $0x82]]  ;;  %s356_s7 = sld [smem:[#allocation4 + $0x1]] }
  0x23   :  { %vm77_vm1 = vcmask 1041409   ;;  %s358_s8 = sld [smem:[#allocation4 + $0x81]]  ;;  %s360_s9 = sld [smem:[#allocation4 + $0x4]] }
  0x24   :  { %v48_v12 = vadd.f32 %v47_v8, %v46_v4  ;;  %v55_v13 = vadd.f32 %v54_v9, %v53_v5  ;;  %v62_v14 = vmax.f32 %v60_v6, %v61_v10  ;;  %v69_v15 = vmax.f32 %v67_v7, %v68_v11  ;;  %s362_s10 = sld [smem:[#allocation4 + $0x84]]  ;;  %s364_s11 = sld [smem:[#allocation4 + $0x5]] }
  0x25   :  { %s366_s12 = sld [smem:[#allocation4 + $0x85]]  ;;  %s368_s13 = sld [smem:[#allocation4 + $0x6]] }
  0x26   :  { %v49_v16 = vrot.slane %v48_v12, 2  ;;  %v56_v17 = vrot.slane %v55_v13, 2  ;;  %v63_v18 = vrot.slane %v62_v14, 2  ;;  %v70_v19 = vrot.slane %v69_v15, 2  ;;  %s370_s14 = sld [smem:[#allocation4 + $0x86]]  ;;  %s372_s15 = sld [smem:[#allocation4 + $0x3]] }
  0x27   :  { %v74_v32 = vld [vmem:[#allocation2] sm:$0x3]  ;;  %v82_v33 = vld [vmem:[#allocation3] sm:$0x3]  ;;  %s374_s16 = sld [smem:[#allocation4 + $0x83]]  ;;  %v115_v38 = vstv %s348_s1  ;;  %v117_v39 = vstv %s350_s4  ;;  %v137_v40 = vstv %s352_s5  ;;  %s301_s17 = smov 3  }
  0x28   :  { %v50_v20 = vadd.f32 %v49_v16, %v48_v12  ;;  %v57_v21 = vadd.f32 %v56_v17, %v55_v13  ;;  %v64_v22 = vmax.f32 %v62_v14, %v63_v18  ;;  %v71_v23 = vmax.f32 %v69_v15, %v70_v19  ;;  %s302_s18 = smov 1   ;;  %s303_s19 = smov 2  }
  0x29   :  { %v139_v41 = vstv %s354_s6  ;;  %v126_v42 = vstv %s356_s7  ;;  %v128_v43 = vstv %s358_s8  ;;  %v148_v44 = vstv %s360_s9  ;;  %s304_s20 = smov 127   ;;  %s305_s21 = smov 126  }
  0x2a   :  { %v51_v24 = vrot.slane %v50_v20, 1  ;;  %v58_v25 = vrot.slane %v57_v21, 1  ;;  %v65_v26 = vrot.slane %v64_v22, 1  ;;  %v72_v27 = vrot.slane %v71_v23, 1  ;;  %s306_s22 = smov 125   ;;  %s307_s23 = smov [#allocation9]  }
  0x2b   :  { %v150_v45 = vstv %s362_s10  ;;  %v159_v46 = vstv %s364_s11  ;;  %v161_v47 = vstv %s366_s12  ;;  %v170_v50 = vstv %s368_s13  ;;  %s194_s24 = sshll.u32 %s307_s23, 4  ;;  %s195_s24 = int_to_ptr.vmem [resolvable:$true] %s194_s24 }
  0x2c   :  { %v52_v28 = vadd.f32 %v51_v24, %v50_v20  ;;  %v59_v29 = vadd.f32 %v58_v25, %v57_v21  ;;  %v66_v30 = vmax.f32 %v64_v22, %v65_v26  ;;  %v73_v31 = vmax.f32 %v71_v23, %v72_v27  ;;  %s267_s25 = scalar_lea.vmem %s195_s24, 32  ;;  %p272_p12 = scmp.lt.s32.totalorder %s195_s24, %s195_s24 }
  0x2d   :  { %v172_v51 = vstv %s370_s14  ;;  %v110_v52 = vstv %s372_s15  ;;  %v112_v53 = vstv %s374_s16  ;;  %v108_v12 = vlaneseq  ;;  %p268_p11 = scmp.ne.s32.totalorder %s195_s24, %s267_s25  ;;  %p273_p13 = scmp.lt.s32.totalorder %s267_s25, %s267_s25 }
  0x2e   :  { %v78_v34 = vsel %vm77_vm1, %v59_v29, %v52_v28  ;;  %v85_v35 = vsel %vm77_vm1, %v73_v31, %v66_v30 }
  0x2f   :  { %v80_v36 = vadd.f32 %v78_v34, %v74_v32  ;;  %v87_v37 = vmax.f32 %v82_v33, %v85_v35  ;;  %v109_v13 = vand.u32 127, %v108_v12  ;;  %p274_p0 = por %p273_p13, %p272_p12 }
  0x31   :  { %81 = vst [vmem:[#allocation2] sm:$0x3] %v80_v36  ;;  %88 = vst [vmem:[#allocation3] sm:$0x3] %v87_v37  ;;  %vm122_vm2 = vcmp.ge.s32.totalorder %v109_v13, 3  ;;  %vm133_vm3 = vcmp.ge.s32.totalorder %v109_v13, 2  ;;  %p275_p1 = pnand %p274_p0, %p268_p11 }
  0x32   :  { %v123_v14 = vsel %vm122_vm2, 1.0, %v299_v2  ;;  %vm144_vm4 = vcmp.ge.s32.totalorder %v109_v13, 1  ;;  %vm155_vm5 = vcmp.lt.s32.totalorder %v109_v13, 127  ;;  %v134_v18 = vsel %vm133_vm3, 1.0, %v299_v2 }
  0x33   :  { %vm166_vm6 = vcmp.lt.s32.totalorder %v109_v13, 126  ;;  %v145_v20 = vsel %vm144_vm4, 1.0, %v299_v2  ;;  %v156_v22 = vsel %vm155_vm5, 1.0, %v299_v2  ;;  %vm177_vm7 = vcmp.lt.s32.totalorder %v109_v13, 125 }
  0x34   :  { %v167_v25 = vsel %vm166_vm6, 1.0, %v299_v2  ;;  %v178_v30 = vsel %vm177_vm7, 1.0, %v299_v2 }
  0x38   :  { %v92_v48 = vld [vmem:[#allocation2] sm:$0x3]  ;;  %v93_v49 = vld [vmem:[#allocation3] sm:$0x3] }
  0x39   :  { %v116_v54 = vmul.f32 %v115_v38, %v92_v48  ;;  %v118_v55 = vmul.f32 %v117_v39, %v93_v49  ;;  %v138_v56 = vmul.f32 %v137_v40, %v92_v48  ;;  %v140_v57 = vmul.f32 %v139_v41, %v93_v49 }
  0x3a   :  { %v127_v58 = vmul.f32 %v126_v42, %v92_v48  ;;  %v129_v59 = vmul.f32 %v128_v43, %v93_v49  ;;  %v149_v60 = vmul.f32 %v148_v44, %v92_v48  ;;  %v151_v61 = vmul.f32 %v150_v45, %v93_v49 }
  0x3b   :  { %v119_v62 = vadd.f32 %v118_v55, %v116_v54  ;;  %v141_v63 = vadd.f32 %v140_v57, %v138_v56  ;;  %v160_v0 = vmul.f32 %v159_v46, %v92_v48  ;;  %v162_v4 = vmul.f32 %v161_v47, %v93_v49 }
  0x3c   :  { %v130_v1 = vadd.f32 %v129_v59, %v127_v58  ;;  %v152_v3 = vadd.f32 %v151_v61, %v149_v60  ;;  %v171_v5 = vmul.f32 %v170_v50, %v92_v48  ;;  %v173_v6 = vmul.f32 %v172_v51, %v93_v49 }
  0x3d   :  { %120 = vrot.lane.b32.xlu0 %v119_v62, %s301_s17  ;;  %142 = vrot.lane.b32.xlu1 %v141_v63, %s302_s18  ;;  %v113_v7 = vmul.f32 %v112_v53, %v93_v49  ;;  %v111_v8 = vmul.f32 %v110_v52, %v92_v48  ;;  %v163_v10 = vadd.f32 %v162_v4, %v160_v0 }
  0x3e   :  { %v174_v11 = vadd.f32 %v173_v6, %v171_v5 }
  0x3f   :  { %v114_v9 = vadd.f32 %v113_v7, %v111_v8 }
  0x41   :  { %131 = vrot.lane.b32.xlu0 %v130_v1, %s303_s19  ;;  %153 = vrot.lane.b32.xlu1 %v152_v3, %s304_s20 }
  0x45   :  { %164 = vrot.lane.b32.xlu0 %v163_v10, %s305_s21  ;;  %175 = vrot.lane.b32.xlu1 %v174_v11, %s306_s22 }
  0xaf   :  { %v121_v15 = vpop.permute.xlu0 %120  ;;  %v143_v16 = vpop.permute.xlu1 %142 }
  0xb0   :  { %v124_v17 = vmul.f32 %v123_v14, %v121_v15  ;;  %v146_v26 = vmul.f32 %v145_v20, %v143_v16 }
  0xb2   :  { %v125_v19 = vadd.f32 %v124_v17, %v114_v9 }
  0xb3   :  { %v132_v21 = vpop.permute.xlu0 %131  ;;  %v154_v23 = vpop.permute.xlu1 %153 }
  0xb4   :  { %v135_v24 = vmul.f32 %v134_v18, %v132_v21  ;;  %v157_v28 = vmul.f32 %v156_v22, %v154_v23 }
  0xb6   :  { %v136_v27 = vadd.f32 %v135_v24, %v125_v19 }
  0xb7   :  { %v165_v29 = vpop.permute.xlu0 %164  ;;  %v176_v31 = vpop.permute.xlu1 %175 }
  0xb8   :  { %v147_v32 = vadd.f32 %v146_v26, %v136_v27  ;;  %v168_v33 = vmul.f32 %v167_v25, %v165_v29  ;;  %v179_v35 = vmul.f32 %v178_v30, %v176_v31 }
  0xba   :  { %v158_v34 = vadd.f32 %v157_v28, %v147_v32 }
  0xbc   :  { %v169_v36 = vadd.f32 %v168_v33, %v158_v34 }
  0xbe   :  { %v180_v37 = vadd.f32 %v179_v35, %v169_v36 }
  0xc0   :  { %v217_v38 = vmul.f32 -1.442695, %v180_v37 }
  0xc2   :  { %231 = vpow2.f32 %v217_v38 }
  0xcc   :  { %v232_v39 = vpop.eup %231 }
  0xcd   :  { %v184_v40 = vadd.f32 1.0, %v232_v39 }
  0xcf   :  { %233 = vrcp.f32 %v184_v40 }
  0xd9   :  { %v234_v41 = vpop.eup %233 }
  0xda   :  { %187 = vst [vmem:[#allocation9] sm:$0x3] %v234_v41 }
  0xdb   :  { %278 = shalt.err (!%p275_p1)
}
  0xdc   :  { %s279_s28 = scalar_lea.hbm %s410_s2, 32 }
  0xdd   :  { %p280_p2 = scmp.ne.s32.totalorder %s410_s2, %s279_s28  ;;  %p283_p3 = scmp.lt.u32.totalorder %s279_s28, %s410_s2 }
  0xdf   :  { %p285_p4 = pnand %p283_p3, %p280_p2 }
  0xe1   :  { %288 = shalt.err (!%p285_p4)
}
  0xe2   :  { %197 = dma.vmem_to_hbm [thread:$0]  %s195_s24, 32, %s410_s2, [#allocation6]  }
  0xe3   :  { %293 = dma.done.wait [#allocation6], 32  }
  0xe4   :  { %294 = vsyncadd [#allocation6], 4294967264 }
  0xe5   :  { %201 = vsyncpa [#allocation5], 1 }
  0xe6   :  { %202 = vsyncpa [#allocation6], 1 }
  0xe7   :  { %203 = vsyncpa [#allocation7], 1 }

</bundles_post_ra>
